<compile_context>
chip_gen: v7x
topology: tpu7x:2x2x1
jax: 0.10.0
libtpu: 0.0.40
codegen_flags: <defaults>
</compile_context>

<pallas_src>
import numpy as np
import jax
import jax.numpy as jnp
from jax.experimental import pallas as pl
from jax.experimental.pallas import tpu as pltpu


# ---------------------------------------------------------------------------
# Kernel: one (TM, L) row tile, L = fold * d_k, pairs interleaved along lanes.
#   out[2k]   = cos_k * x[2k]   - sin_k * x[2k+1]
#   out[2k+1] = sin_k * x[2k]   + cos_k * x[2k+1]
# cs_ref holds cos_k on lane 2k and sin_k on lane 2k+1 (already gathered at
# the row's token position).
# ---------------------------------------------------------------------------
def rope_kernel(x_ref, cs_ref, o_ref):
    x = x_ref[...].astype(jnp.float32)      # (TM, L), cast in-kernel (free VPU)
    cs = cs_ref[...].astype(jnp.float32)    # (TM, L) interleaved cos/sin

    L = x.shape[-1]
    lane = jax.lax.broadcasted_iota(jnp.int32, x.shape, dimension=1)
    is_even = (lane & 1) == 0

    # Lane-parity reconstruction; rolls go to the (otherwise idle) XLU slot.
    cs_from_left = pltpu.roll(cs, shift=1, axis=1)        # lane j <- cs[j-1]
    cs_from_right = pltpu.roll(cs, shift=L - 1, axis=1)   # lane j <- cs[j+1]
    x_from_left = pltpu.roll(x, shift=1, axis=1)          # lane j <- x[j-1]
    x_from_right = pltpu.roll(x, shift=L - 1, axis=1)     # lane j <- x[j+1]

    cos_full = jnp.where(is_even, cs, cs_from_left)       # cos_k on lanes 2k, 2k+1
    sin_signed = jnp.where(is_even, -cs_from_right, cs)   # -sin_k even, +sin_k odd
    x_swap = jnp.where(is_even, x_from_right, x_from_left)  # pair partner of x

    # Wrap-around lanes of each roll are masked out by the parity select.
    o_ref[...] = x * cos_full + x_swap * sin_signed


# ---------------------------------------------------------------------------
# Table construction (identical math to the PyTorch __init__) plus the
# interleaved kernel table.  table_dtype=jnp.bfloat16 halves table HBM traffic
# if the accuracy budget allows.
# ---------------------------------------------------------------------------
def make_rope_tables(theta: float, d_k: int, max_seq_len: int,
                     table_dtype=jnp.float32):
    assert d_k % 2 == 0, "d_k must be even"
    i = jnp.arange(max_seq_len, dtype=jnp.float32)[:, None]       # (L, 1)
    k = jnp.arange(d_k // 2, dtype=jnp.float32)[None, :]          # (1, d_k/2)
    ang = i / (theta ** (2.0 * k / d_k))                          # (L, d_k/2)
    r_cos = jnp.cos(ang)
    r_sin = jnp.sin(ang)
    # Interleaved: r_cs[:, 2k] = cos_k, r_cs[:, 2k+1] = sin_k
    r_cs = jnp.stack([r_cos, r_sin], axis=-1).reshape(max_seq_len, d_k)
    return r_cos, r_sin, r_cs.astype(table_dtype)


def rope_forward(x, token_positions, r_cs, *, tm_target: int = 1024):
    """x: (..., S, D) any float dtype, token_positions: (..., S) int.

    Returns float32 (..., S, D), matching the PyTorch reference.
    """
    assert tm_target % 8 == 0
    orig_shape = x.shape
    D = x.shape[-1]
    S = x.shape[-2]
    batch_shape = x.shape[:-2]
    B = int(np.prod(batch_shape)) if batch_shape else 1
    N = B * S

    pos = jnp.broadcast_to(token_positions, batch_shape + (S,)).reshape(N)

    # Single gather of the interleaved table: D values per token total
    # (== two half-width tables), done once in XLA.
    # TODO(synk): for contiguous token positions this gather could be replaced
    # by a scalar-prefetched offset in the cos/sin index_map (zero gather traffic).
    cs = jnp.take(r_cs, pos, axis=0)                      # (N, D)

    # Fold consecutive rows into the lane dim when D < 128 (free reshape of
    # contiguous data) so stores are 128-lane dense and unmasked.
    fold = 1
    if D < 128 and 128 % D == 0 and N % (128 // D) == 0:
        fold = 128 // D
    Nr = N // fold
    L = fold * D

    x2 = x.reshape(Nr, L)                                 # native dtype, no copy
    cs2 = cs.reshape(Nr, L)

    # Row tile: full array if small, else tm_target rows (multiple of 8);
    # ragged tails are handled by Pallas block padding (pure elementwise map).
    TM = Nr if Nr <= tm_target else tm_target
    grid = (pl.cdiv(Nr, TM),)

    out = pl.pallas_call(
        rope_kernel,
        out_shape=jax.ShapeDtypeStruct((Nr, L), jnp.float32),
        grid=grid,
        in_specs=[
            pl.BlockSpec((TM, L), lambda i: (i, 0)),      # x, native dtype
            pl.BlockSpec((TM, L), lambda i: (i, 0)),      # interleaved cos/sin
        ],
        out_specs=pl.BlockSpec((TM, L), lambda i: (i, 0)),
        compiler_params=pltpu.CompilerParams(
            dimension_semantics=("parallel",)),           # megacore-splittable
    )(x2, cs2)

    # Reference module returns float32 (torch.empty default dtype).
    return out.reshape(orig_shape)


# ---------------------------------------------------------------------------
# Pure-JAX reference (mirrors the PyTorch per-pair loop, vectorized).
# ---------------------------------------------------------------------------
def rope_reference(x, token_positions, r_cos, r_sin):
    cos = r_cos[token_positions]          # (..., S, D//2)
    sin = r_sin[token_positions]
    x = x.astype(jnp.float32)
    x_even = x[..., 0::2]
    x_odd = x[..., 1::2]
    out_even = cos * x_even - sin * x_odd
    out_odd = sin * x_even + cos * x_odd
    return jnp.stack([out_even, out_odd], axis=-1).reshape(x.shape)


if __name__ == "__main__":
    theta = 10000.0
    d_k = 32
    max_seq_len = 16
    batch, seq = 2, 8

    key = jax.random.PRNGKey(0)
    kx, kp = jax.random.split(key)
    x = jax.random.normal(kx, (batch, seq, d_k), dtype=jnp.float32)
    token_positions = jax.random.randint(kp, (batch, seq), 0, max_seq_len,
                                         dtype=jnp.int32)

    r_cos, r_sin, r_cs = make_rope_tables(theta, d_k, max_seq_len)

    out = rope_forward(x, token_positions, r_cs)
    out = jax.block_until_ready(out)

    ref = rope_reference(x, token_positions, r_cos, r_sin)
    if not np.allclose(np.asarray(out), np.asarray(ref), atol=1e-5, rtol=1e-5):
        raise AssertionError("Pallas RoPE kernel does not match reference")

    print("KERNEL_OK")
</pallas_src>

<mosaic_0001>
module attributes {stable_mosaic.version = 11 : i64} {
  func.func @rope_kernel(%arg0: i32, %arg1: memref<4x128xf32, #tpu.memory_space<vmem>>, %arg2: memref<4x128xf32, #tpu.memory_space<vmem>>, %arg3: memref<4x128xf32, #tpu.memory_space<vmem>>) attributes {dimension_semantics = [#tpu.dimension_semantics<parallel>], iteration_bounds = array<i64: 1>, scalar_prefetch = 0 : i64, scratch_operands = 0 : i64, tpu.core_type = #tpu.core_type<tc>, window_params = [{transform_indices = @transform_0, window_bounds = array<i64: 4, 128>}, {transform_indices = @transform_1, window_bounds = array<i64: 4, 128>}, {transform_indices = @transform_2, window_bounds = array<i64: 4, 128>}]} {
    %c0 = arith.constant 0 : index
    %c0_0 = arith.constant 0 : index
    %0 = vector.load %arg1[%c0, %c0_0] : memref<4x128xf32, #tpu.memory_space<vmem>>, vector<4x128xf32>
    %c0_1 = arith.constant 0 : index
    %c0_2 = arith.constant 0 : index
    %1 = vector.load %arg2[%c0_1, %c0_2] : memref<4x128xf32, #tpu.memory_space<vmem>>, vector<4x128xf32>
    %2 = tpu.iota {dimensions = array<i32: 1>} : vector<4x128xi32>
    %c1_i32 = arith.constant 1 : i32
    %3 = vector.broadcast %c1_i32 : i32 to vector<4x128xi32>
    %4 = arith.andi %2, %3 : vector<4x128xi32>
    %c0_i32 = arith.constant 0 : i32
    %5 = vector.broadcast %c0_i32 : i32 to vector<4x128xi32>
    %6 = arith.cmpi eq, %4, %5 : vector<4x128xi32>
    %c1_i32_3 = arith.constant 1 : i32
    %7 = tpu.dynamic_rotate %1 by %c1_i32_3 dim 1 : vector<4x128xf32>, i32 -> vector<4x128xf32>
    %c127_i32 = arith.constant 127 : i32
    %8 = tpu.dynamic_rotate %1 by %c127_i32 dim 1 : vector<4x128xf32>, i32 -> vector<4x128xf32>
    %c1_i32_4 = arith.constant 1 : i32
    %9 = tpu.dynamic_rotate %0 by %c1_i32_4 dim 1 : vector<4x128xf32>, i32 -> vector<4x128xf32>
    %c127_i32_5 = arith.constant 127 : i32
    %10 = tpu.dynamic_rotate %0 by %c127_i32_5 dim 1 : vector<4x128xf32>, i32 -> vector<4x128xf32>
    %11 = arith.select %6, %1, %7 : vector<4x128xi1>, vector<4x128xf32>
    %cst = arith.constant 0.000000e+00 : f32
    %12 = vector.broadcast %cst : f32 to vector<4x128xf32>
    %13 = arith.subf %12, %8 : vector<4x128xf32>
    %14 = arith.select %6, %13, %1 : vector<4x128xi1>, vector<4x128xf32>
    %15 = arith.select %6, %10, %9 : vector<4x128xi1>, vector<4x128xf32>
    %16 = arith.mulf %0, %11 : vector<4x128xf32>
    %17 = arith.mulf %15, %14 : vector<4x128xf32>
    %18 = arith.addf %16, %17 : vector<4x128xf32>
    %c0_6 = arith.constant 0 : index
    %c0_7 = arith.constant 0 : index
    %19 = vector.load %arg3[%c0_6, %c0_7] : memref<4x128xf32, #tpu.memory_space<vmem>>, vector<4x128xf32>
    tpu.vector_store %arg3[%c0_6, %c0_7], %18 {strides = array<i32>} : memref<4x128xf32, #tpu.memory_space<vmem>>, vector<4x128xf32>,
    return
  }
  func.func @transform_0(%arg0: i32) -> (i32, i32) {
    %c0_i32 = arith.constant 0 : i32
    %c0_i32_0 = arith.constant 0 : i32
    return %arg0, %c0_i32 : i32, i32
  }
  func.func @transform_1(%arg0: i32) -> (i32, i32) {
    %c0_i32 = arith.constant 0 : i32
    %c0_i32_0 = arith.constant 0 : i32
    return %arg0, %c0_i32 : i32, i32
  }
  func.func @transform_2(%arg0: i32) -> (i32, i32) {
    %c0_i32 = arith.constant 0 : i32
    %c0_i32_0 = arith.constant 0 : i32
    return %arg0, %c0_i32 : i32, i32
  }
}

</mosaic_0001>

<bundles_post_ra>
// kernel: tpu_custom_call.1
= control target key start
LH: loop header
LB: loop body
LE: loop exit
PB: predicated region body
PF: predicated region fallthrough
CT: control target
= control target key end

     0   :  { %7 = vsyncpa [#allocation3], 0  ;;  %s207_s0 = inlined_call_operand.hbm [shape: f32[4,128], index: 0, kind: input, shape index: {}]   ;;  %s208_s1 = inlined_call_operand.hbm [shape: f32[4,128], index: 1, kind: input, shape index: {}]   ;;  %s209_s2 = inlined_call_operand.hbm [shape: f32[4,128], index: 2, kind: output, shape index: {}]  }
   0x1   :  { %8 = vsyncpa [#allocation6], 0 }
   0x2   :  { %9 = vsyncpa [#allocation4], 0  ;;  %s151_s9 = smov [#allocation2]   ;;  %s152_s11 = smov [#allocation5]  }
   0x3   :  { %s16_s10 = sshll.u32 %s151_s9, 4  ;;  %s26_s12 = sshll.u32 %s152_s11, 4  ;;  %s17_s10 = int_to_ptr.vmem [resolvable:$true] %s16_s10  ;;  %s27_s12 = int_to_ptr.vmem [resolvable:$true] %s26_s12 }
   0x4   :  { %s79_s15 = scalar_lea.hbm %s207_s0, 64 }
   0x5   :  { %p80_p0 = scmp.ne.s32.totalorder %s207_s0, %s79_s15  ;;  %p83_p1 = scmp.lt.u32.totalorder %s79_s15, %s207_s0 }
   0x7   :  { %p85_p2 = pnand %p83_p1, %p80_p0 }
   0x9   :  { %88 = shalt.err (!%p85_p2)
}
   0xa   :  { %s89_s20 = scalar_lea.vmem %s17_s10, 64  ;;  %p94_p4 = scmp.lt.s32.totalorder %s17_s10, %s17_s10 }
   0xb   :  { %p90_p3 = scmp.ne.s32.totalorder %s17_s10, %s89_s20  ;;  %p95_p5 = scmp.lt.s32.totalorder %s89_s20, %s89_s20 }
   0xd   :  { %p96_p6 = por %p95_p5, %p94_p4 }
   0xf   :  { %p97_p7 = pnand %p96_p6, %p90_p3 }
  0x11   :  { %100 = shalt.err (!%p97_p7)
}
  0x12   :  { %19 = dma.hbm_to_vmem [thread:$0]  %s207_s0, 64, %s17_s10, [#allocation3]  }
  0x13   :  { %s101_s25 = scalar_lea.hbm %s208_s1, 64 }
  0x14   :  { %p102_p8 = scmp.ne.s32.totalorder %s208_s1, %s101_s25  ;;  %p105_p9 = scmp.lt.u32.totalorder %s101_s25, %s208_s1 }
  0x16   :  { %p107_p10 = pnand %p105_p9, %p102_p8 }
  0x18   :  { %110 = shalt.err (!%p107_p10)
}
  0x19   :  { %s111_s30 = scalar_lea.vmem %s27_s12, 64  ;;  %p116_p12 = scmp.lt.s32.totalorder %s27_s12, %s27_s12 }
  0x1a   :  { %p112_p11 = scmp.ne.s32.totalorder %s27_s12, %s111_s30  ;;  %p117_p13 = scmp.lt.s32.totalorder %s111_s30, %s111_s30 }
  0x1c   :  { %p118_p0 = por %p117_p13, %p116_p12 }
  0x1e   :  { %p119_p1 = pnand %p118_p0, %p112_p11 }
  0x20   :  { %122 = shalt.err (!%p119_p1)
}
  0x21   :  { %29 = dma.hbm_to_vmem [thread:$0]  %s208_s1, 64, %s27_s12, [#allocation6]  }
  0x22   :  { %145 = dma.done.wait [#allocation3], 64  }
  0x23   :  { %146 = vsyncadd [#allocation3], 4294967232 }
  0x24   :  { %147 = dma.done.wait [#allocation6], 64  }
  0x25   :  { %148 = vsyncadd [#allocation6], 4294967232  ;;  %v37_v0 = vld [vmem:[#allocation5] sm:$0xf]  ;;  %v36_v1 = vld [vmem:[#allocation2] sm:$0xf]  ;;  %v38_v2 = vlaneseq }
  0x26   :  { %s153_s4 = smov 127   ;;  %s154_s5 = smov 1  }
  0x27   :  { %44 = vrot.lane.b32.xlu0 %v37_v0, %s153_s4  ;;  %46 = vrot.lane.b32.xlu1 %v36_v1, %s154_s5  ;;  %v39_v3 = vand.u32 127, %v38_v2  ;;  %s155_s1 = smov [#allocation7]  }
  0x28   :  { %s64_s6 = sshll.u32 %s155_s1, 4  ;;  %s65_s6 = int_to_ptr.vmem [resolvable:$true] %s64_s6 }
  0x29   :  { %v40_v4 = vand.u32 1, %v39_v3  ;;  %s123_s7 = scalar_lea.vmem %s65_s6, 64  ;;  %p128_p3 = scmp.lt.s32.totalorder %s65_s6, %s65_s6 }
  0x2a   :  { %p124_p2 = scmp.ne.s32.totalorder %s65_s6, %s123_s7  ;;  %p129_p4 = scmp.lt.s32.totalorder %s123_s7, %s123_s7 }
  0x2b   :  { %42 = vrot.lane.b32.xlu0 %v37_v0, %s154_s5  ;;  %48 = vrot.lane.b32.xlu1 %v36_v1, %s153_s4  ;;  %vm41_vm0 = vcmp.eq.s32.totalorder %v40_v4, 0 }
  0x2c   :  { %p130_p5 = por %p129_p4, %p128_p3 }
  0x2e   :  { %p131_p6 = pnand %p130_p5, %p124_p2 }
  0x99   :  { %v45_v5 = vpop.permute.xlu0 %44  ;;  %v47_v6 = vpop.permute.xlu1 %46 }
  0x9a   :  { %v51_v7 = vsub.f32 0.0, %v45_v5 }
  0x9c   :  { %v52_v11 = vsel %vm41_vm0, %v51_v7, %v37_v0 }
  0x9d   :  { %v43_v8 = vpop.permute.xlu0 %42  ;;  %v49_v9 = vpop.permute.xlu1 %48 }
  0x9e   :  { %v50_v10 = vsel %vm41_vm0, %v37_v0, %v43_v8  ;;  %v53_v12 = vsel %vm41_vm0, %v49_v9, %v47_v6 }
  0x9f   :  { %v54_v13 = vmul.f32 %v50_v10, %v36_v1  ;;  %v55_v14 = vmul.f32 %v53_v12, %v52_v11 }
  0xa1   :  { %v56_v15 = vadd.f32 %v55_v14, %v54_v13 }
  0xa3   :  { %57 = vst [vmem:[#allocation7] sm:$0xf] %v56_v15 }
  0xa4   :  { %134 = shalt.err (!%p131_p6)
}
  0xa5   :  { %s135_s10 = scalar_lea.hbm %s209_s2, 64 }
  0xa6   :  { %p136_p7 = scmp.ne.s32.totalorder %s209_s2, %s135_s10  ;;  %p139_p8 = scmp.lt.u32.totalorder %s135_s10, %s209_s2 }
  0xa8   :  { %p141_p9 = pnand %p139_p8, %p136_p7 }
  0xaa   :  { %144 = shalt.err (!%p141_p9)
}
  0xab   :  { %67 = dma.vmem_to_hbm [thread:$0]  %s65_s6, 64, %s209_s2, [#allocation4]  }
  0xac   :  { %149 = dma.done.wait [#allocation4], 64  }
  0xad   :  { %150 = vsyncadd [#allocation4], 4294967232 }
  0xae   :  { %71 = vsyncpa [#allocation3], 1 }
  0xaf   :  { %72 = vsyncpa [#allocation6], 1 }
  0xb0   :  { %73 = vsyncpa [#allocation4], 1 }

</bundles_post_ra>
